<compile_context>
chip_gen: v7x
topology: tpu7x:2x2x1
jax: 0.10.0
libtpu: 0.0.40
codegen_flags: <defaults>
</compile_context>

<pallas_src>
import functools
import warnings

import jax
import jax.numpy as jnp
import numpy as np
from jax.experimental import pallas as pl
from jax.experimental.pallas import tpu as pltpu


# ---------------------------------------------------------------------------
# Hardware-aware budgets (feedback item 1).
# ---------------------------------------------------------------------------
@functools.lru_cache(maxsize=None)
def _physical_vmem_bytes():
    phys = 0
    try:
        info = pltpu.get_tpu_info()
        phys = int(getattr(info, "vmem_capacity_bytes", 0) or 0)
    except Exception:
        phys = 0
    if phys <= 0:
        try:
            kind = jax.devices()[0].device_kind.lower()
            if any(tag in kind for tag in ("v4", "v5", "v6")):
                phys = 128 << 20          # v4/v5e/v6e: 128 MiB VMEM
        except Exception:
            pass
    if phys <= 0:
        phys = 64 << 20                   # assume the smallest (v7x) if unknown
    return phys


@functools.lru_cache(maxsize=None)
def _vmem_limit_bytes():
    phys = _physical_vmem_bytes()
    # ~41 MiB on a 64 MiB part (v7x), ~83 MiB on a 128 MiB part (v5e/v6e).
    return int(max(32 << 20, min(int(phys * 0.65), phys - (16 << 20), 112 << 20)))


def _target_rows():
    # Larger per-step tiles on big-VMEM parts (v5e/v6e) to amortize the
    # ~0.35 us/grid-step overhead; conservative on v7x (64 MiB).
    return 1024 if _vmem_limit_bytes() > (48 << 20) else 512


# ---------------------------------------------------------------------------
# Kernel bodies.
# ---------------------------------------------------------------------------
def _embed_matmul_kernel(patches_ref, w_ref, pospb_ref, clspos_ref, out_ref, *,
                         n_patch, bt):
    """Pre-patchified path.

    patches_ref : (bt*N, Kp)  flattened patches (lane-padded K)
    w_ref       : (Kp, D)     projection matrix, columns ordered (ci, phi, pwi)
    pospb_ref   : (N, D)      position_embedding[:N] + conv bias   (f32)
    clspos_ref  : (1, D)      cls_token + position_embedding[N]    (f32)
    out_ref     : (bt, N+1, D)
    """
    proj = jnp.dot(patches_ref[...], w_ref[...],
                   preferred_element_type=jnp.float32)            # (bt*N, D)
    pospb = pospb_ref[...]
    cls = clspos_ref[...]
    slabs = []
    for i in range(bt):
        rows = proj[i * n_patch:(i + 1) * n_patch, :] + pospb      # (N, D)
        slabs.append(jnp.concatenate([rows, cls], axis=0))         # (N+1, D)
    # Single full-block store; the cls row is merged into the slab (no
    # separate masked (1, D) stores).
    out_ref[...] = jnp.stack(slabs, axis=0).astype(out_ref.dtype)


def _embed_fused_dma_kernel(x_ref, w_ref, pospb_ref, clspos_ref, out_ref,
                            patch_sc, *, c, p, hp, wp, bt):
    """In-kernel patchify path (no wrapper-side HBM round trip).

    x_ref    : (bt, c, H, W)   raw NCHW image block
    w_ref    : (K, D)          projection matrix, columns ordered (pwi, ci, phi)
    patch_sc : (bt*N, K)       VMEM staging scratch (matmul dtype)
    out_ref  : (bt, N+1, D)
    """
    n_patch = hp * wp
    # Stage patches: per patch-row, slice (c, p, W), merge (c,p) into sublanes,
    # 2-D transpose, and lay groups of p rows out along lanes.
    for i in range(bt):
        for hi in range(hp):
            slab = x_ref[i, :, hi * p:(hi + 1) * p, :]             # (c, p, W)
            s2 = slab.reshape(c * p, wp * p)                       # rows (ci,phi)  cols (wi,pwi)
            t = s2.T                                               # rows (wi,pwi)  cols (ci,phi)
            pt = t.reshape(wp, p * c * p)                          # rows wi        cols (pwi,ci,phi)
            r0 = i * n_patch + hi * wp
            patch_sc[r0:r0 + wp, :] = pt.astype(patch_sc.dtype)
    # One fused matmul over all bt*N staged rows.
    proj = jnp.dot(patch_sc[...], w_ref[...],
                   preferred_element_type=jnp.float32)             # (bt*N, D)
    pospb = pospb_ref[...]
    cls = clspos_ref[...]
    slabs = []
    for i in range(bt):
        rows = proj[i * n_patch:(i + 1) * n_patch, :] + pospb
        slabs.append(jnp.concatenate([rows, cls], axis=0))
    out_ref[...] = jnp.stack(slabs, axis=0).astype(out_ref.dtype)


# ---------------------------------------------------------------------------
# Cached pallas_call builders.
# ---------------------------------------------------------------------------
@functools.lru_cache(maxsize=None)
def _build_patches_call(b, n_patch, kp, hidden, bt, patches_dtype, out_dtype):
    patches_dtype = np.dtype(patches_dtype)
    out_dtype = np.dtype(out_dtype)
    flops = 2 * b * n_patch * kp * hidden
    bytes_accessed = (b * n_patch * kp * patches_dtype.itemsize
                      + kp * hidden * patches_dtype.itemsize
                      + (n_patch + 2) * hidden * 4
                      + b * (n_patch + 1) * hidden * out_dtype.itemsize)
    kernel = functools.partial(_embed_matmul_kernel, n_patch=n_patch, bt=bt)
    call = pl.pallas_call(
        kernel,
        out_shape=jax.ShapeDtypeStruct((b, n_patch + 1, hidden), out_dtype),
        grid_spec=pltpu.PrefetchScalarGridSpec(
            num_scalar_prefetch=0,
            grid=(b // bt,),
            in_specs=[
                pl.BlockSpec((bt * n_patch, kp), lambda i: (i, 0)),
                pl.BlockSpec((kp, hidden), lambda i: (0, 0)),
                pl.BlockSpec((n_patch, hidden), lambda i: (0, 0)),
                pl.BlockSpec((1, hidden), lambda i: (0, 0)),
            ],
            out_specs=pl.BlockSpec((bt, n_patch + 1, hidden),
                                   lambda i: (i, 0, 0)),
        ),
        compiler_params=pltpu.CompilerParams(
            dimension_semantics=("parallel",),
            vmem_limit_bytes=_vmem_limit_bytes()),
        cost_estimate=pl.CostEstimate(flops=int(flops), transcendentals=0,
                                      bytes_accessed=int(bytes_accessed)),
    )
    return jax.jit(call)


@functools.lru_cache(maxsize=None)
def _build_fused_dma_call(b, c, img_h, img_w, p, hidden, bt, x_dtype,
                          matmul_dtype, out_dtype):
    x_dtype = np.dtype(x_dtype)
    matmul_dtype = np.dtype(matmul_dtype)
    out_dtype = np.dtype(out_dtype)
    hp, wp = img_h // p, img_w // p
    n_patch = hp * wp
    k = c * p * p
    flops = 2 * b * n_patch * k * hidden
    bytes_accessed = (b * c * img_h * img_w * x_dtype.itemsize
                      + k * hidden * matmul_dtype.itemsize
                      + (n_patch + 2) * hidden * 4
                      + b * (n_patch + 1) * hidden * out_dtype.itemsize)
    kernel = functools.partial(_embed_fused_dma_kernel,
                               c=c, p=p, hp=hp, wp=wp, bt=bt)
    call = pl.pallas_call(
        kernel,
        out_shape=jax.ShapeDtypeStruct((b, n_patch + 1, hidden), out_dtype),
        grid_spec=pltpu.PrefetchScalarGridSpec(
            num_scalar_prefetch=0,
            grid=(b // bt,),
            in_specs=[
                pl.BlockSpec((bt, c, img_h, img_w), lambda i: (i, 0, 0, 0)),
                pl.BlockSpec((k, hidden), lambda i: (0, 0)),
                pl.BlockSpec((n_patch, hidden), lambda i: (0, 0)),
                pl.BlockSpec((1, hidden), lambda i: (0, 0)),
            ],
            out_specs=pl.BlockSpec((bt, n_patch + 1, hidden),
                                   lambda i: (i, 0, 0)),
            scratch_shapes=[pltpu.VMEM((bt * n_patch, k), matmul_dtype)],
        ),
        compiler_params=pltpu.CompilerParams(
            dimension_semantics=("parallel",),
            vmem_limit_bytes=_vmem_limit_bytes()),
        cost_estimate=pl.CostEstimate(flops=int(flops), transcendentals=0,
                                      bytes_accessed=int(bytes_accessed)),
    )
    return jax.jit(call)


# ---------------------------------------------------------------------------
# Batch-tile selection for the pre-patchified path.
# ---------------------------------------------------------------------------
def _pick_batch_tile(b, n_patch, kp, hidden, in_isz, w_isz, out_isz):
    budget = _vmem_limit_bytes()
    target_bt = max(1, _target_rows() // max(1, n_patch))

    def aligned(t):                       # 2-D block sublane alignment
        return t == b or (t * n_patch) % 8 == 0

    def fits(t):
        need = (2 * t * n_patch * kp * in_isz                  # patch blocks (x2 buf)
                + 2 * t * (n_patch + 1) * hidden * out_isz     # out blocks  (x2 buf)
                + 2 * (kp * hidden * w_isz                     # weight      (x2 buf)
                       + (n_patch + 2) * hidden * 4)           # pos/cls rows
                + (2 << 20))                                   # headroom
        return need <= budget

    divs = [t for t in range(1, b + 1) if b % t == 0]
    cands = [t for t in divs if aligned(t) and fits(t)]
    if not cands:
        cands = [t for t in divs if aligned(t)] or [b]
    # Prefer grid >= 2 so both v7x TensorCores get work (item 5).
    pref = [t for t in cands if b // t >= 2] or cands
    le = [t for t in pref if t <= min(target_bt, b)]
    return max(le) if le else min(pref)


# ---------------------------------------------------------------------------
# Public forward.
# ---------------------------------------------------------------------------
_FUSED_DMA_OK = {}


def _is_tracer(a):
    try:
        return isinstance(a, jax.core.Tracer)
    except Exception:
        return False


def embedding_layer_forward(x, conv_w, conv_b, cls_token, pos_emb, *,
                            patch_size, matmul_dtype=None, out_dtype=None,
                            in_kernel_patchify="auto"):
    """x: (b, 3, H, W) NCHW -> (b, num_patch + 1, hidden_dim).

    matmul_dtype : opt-in lower-precision matmul operands (e.g. jnp.bfloat16);
                   accumulation and the pos/bias adds stay f32.
    out_dtype    : opt-in output dtype (e.g. bf16 on v7x to halve output HBM
                   traffic); defaults to pos_emb.dtype.
    in_kernel_patchify : "auto"/True/False.  auto/True uses the fused-DMA
                   in-kernel patchify path (validated once per config, with a
                   warned fallback); False forces the pre-patchified path.
    """
    b, c, img_h, img_w = x.shape
    p = int(patch_size)
    hp, wp = img_h // p, img_w // p
    n_patch = hp * wp
    hidden = conv_w.shape[0]
    k = c * p * p
    out_dtype = np.dtype(out_dtype) if out_dtype is not None else np.dtype(pos_emb.dtype)
    mm_dtype = np.dtype(matmul_dtype) if matmul_dtype is not None else np.dtype(x.dtype)

    # Batch-invariant rows (precomputed once per call; the kernels never
    # recompute them):  pos[:N] + conv_bias  and  pos[N] + cls_token.
    pos32 = pos_emb[0].astype(jnp.float32)                               # (N+1, D)
    pospb = pos32[:n_patch] + conv_b.astype(jnp.float32)[None, :]        # (N, D)
    clspos = pos32[n_patch:] + cls_token[0, 0].astype(jnp.float32)[None, :]

    def run_prepatchified():
        # Wrapper-side patchify (reshape/transpose only, no compute).
        xc = x[:, :, :hp * p, :wp * p]
        patches = xc.reshape(b, c, hp, p, wp, p)
        patches = patches.transpose(0, 2, 4, 1, 3, 5).reshape(b * n_patch, k)
        w_mat = conv_w.reshape(hidden, k).T                              # (k, D)
        if matmul_dtype is not None:      # cast fuses into the transpose output
            patches = patches.astype(mm_dtype)
            w_mat = w_mat.astype(mm_dtype)
        kp = ((k + 127) // 128) * 128                                    # lane-dense K
        if kp != k:
            patches = jnp.pad(patches, ((0, 0), (0, kp - k)))
            w_mat = jnp.pad(w_mat, ((0, kp - k), (0, 0)))
        bt = _pick_batch_tile(b, n_patch, kp, hidden,
                              patches.dtype.itemsize, w_mat.dtype.itemsize,
                              out_dtype.itemsize)
        call = _build_patches_call(b, n_patch, kp, hidden, bt,
                                   str(patches.dtype), str(out_dtype))
        return call(patches, w_mat, pospb, clspos)

    want_fused = (in_kernel_patchify in (True, "auto")
                  and p % 8 == 0 and img_h % p == 0 and img_w % p == 0)
    if not want_fused:
        return run_prepatchified()

    # Fused-DMA path: weight rows reordered to (pwi, ci, phi) to match the
    # in-kernel patch flattening (transpose + reshape).
    w_perm = conv_w.transpose(3, 1, 2, 0).reshape(k, hidden)
    if matmul_dtype is not None:
        w_perm = w_perm.astype(mm_dtype)
    bt_f = 2 if (b % 2 == 0 and b >= 4) else 1          # grid >= 2 for v7x
    fused_call = _build_fused_dma_call(b, c, img_h, img_w, p, hidden, bt_f,
                                       str(np.dtype(x.dtype)), str(mm_dtype),
                                       str(out_dtype))
    cfg = (b, c, img_h, img_w, p, hidden,
           str(np.dtype(x.dtype)), str(mm_dtype), str(out_dtype))
    decision = _FUSED_DMA_OK.get(cfg)
    if decision is True:
        return fused_call(x, w_perm, pospb, clspos)
    if decision is False:
        return run_prepatchified()
    if any(_is_tracer(a) for a in (x, conv_w, conv_b, cls_token, pos_emb)):
        # Cannot probe under tracing; use the known-good path.
        return run_prepatchified()

    # One-time probe per configuration.  The broad except is confined here on
    # purpose: a lowering failure of the optional fused-DMA path must only
    # disable that optimization (with a visible warning), never silently
    # change the tiling of the main path.
    try:
        out_fused = jax.block_until_ready(fused_call(x, w_perm, pospb, clspos))
        out_base = jax.block_until_ready(run_prepatchified())
        tol = 5e-2 if matmul_dtype is not None else 1e-3
        ok = bool(jnp.allclose(out_fused.astype(jnp.float32),
                               out_base.astype(jnp.float32),
                               rtol=tol, atol=tol))
    except Exception as e:  # Mosaic reshape/transpose support varies by jax version
        warnings.warn("in-kernel patchify path disabled "
                      f"({type(e).__name__}: {e}); using pre-patchified path")
        _FUSED_DMA_OK[cfg] = False
        return run_prepatchified()
    _FUSED_DMA_OK[cfg] = ok
    if not ok:
        warnings.warn("in-kernel patchify path failed validation; "
                      "using pre-patchified path")
        return out_base
    return out_fused


# ---------------------------------------------------------------------------
# Pure-JAX reference matching the PyTorch forward exactly.
# ---------------------------------------------------------------------------
def _reference_forward(x, conv_w, conv_b, cls_token, pos_emb, *, patch_size):
    b = x.shape[0]
    hidden = conv_w.shape[0]
    y = jax.lax.conv_general_dilated(
        x, conv_w, window_strides=(patch_size, patch_size), padding="VALID",
        dimension_numbers=("NCHW", "OIHW", "NCHW"))
    y = y + conv_b.reshape(1, hidden, 1, 1)
    y = y.reshape(b, hidden, -1).transpose(0, 2, 1)                    # (b, N, D)
    cls = jnp.broadcast_to(cls_token, (b, 1, hidden))
    y = jnp.concatenate([y, cls], axis=1)                              # (b, N+1, D)
    return y + pos_emb


if __name__ == "__main__":
    # Small deterministic config consistent with the module (in_channels=3).
    batch = 2
    in_ch = 3
    img = 16
    patch_size = 8                 # p % 8 == 0 so the fused-DMA path is exercised
    hidden_dim = 32
    num_patch = (img // patch_size) ** 2      # 4

    key = jax.random.PRNGKey(0)
    kx, kw, kb, kc, kpos = jax.random.split(key, 5)

    x = jax.random.normal(kx, (batch, in_ch, img, img), dtype=jnp.float32)
    conv_w = jax.random.normal(
        kw, (hidden_dim, in_ch, patch_size, patch_size), dtype=jnp.float32) * 0.05
    conv_b = jax.random.normal(kb, (hidden_dim,), dtype=jnp.float32) * 0.05
    cls_token = jax.random.normal(kc, (1, 1, hidden_dim), dtype=jnp.float32)
    pos_emb = jax.random.normal(kpos, (1, num_patch + 1, hidden_dim),
                                dtype=jnp.float32)

    ref = _reference_forward(x, conv_w, conv_b, cls_token, pos_emb,
                             patch_size=patch_size)

    # Default path ("auto": in-kernel patchify with validated fallback).
    out = jax.block_until_ready(embedding_layer_forward(
        x, conv_w, conv_b, cls_token, pos_emb, patch_size=patch_size))
    assert out.shape == (batch, num_patch + 1, hidden_dim), out.shape
    np.testing.assert_allclose(np.asarray(out), np.asarray(ref),
                               rtol=1e-4, atol=1e-4)

    # Pre-patchified path, explicitly.
    out_pp = jax.block_until_ready(embedding_layer_forward(
        x, conv_w, conv_b, cls_token, pos_emb, patch_size=patch_size,
        in_kernel_patchify=False))
    np.testing.assert_allclose(np.asarray(out_pp), np.asarray(ref),
                               rtol=1e-4, atol=1e-4)

    # bf16 matmul-operand path (opt-in, v6e/v7x DMA-bytes win); f32 accumulate.
    out_bf16 = jax.block_until_ready(embedding_layer_forward(
        x, conv_w, conv_b, cls_token, pos_emb, patch_size=patch_size,
        matmul_dtype=jnp.bfloat16))
    np.testing.assert_allclose(np.asarray(out_bf16), np.asarray(ref),
                               rtol=5e-2, atol=5e-2)

    print("KERNEL_OK")
</pallas_src>

<mosaic_0001>
module attributes {stable_mosaic.version = 11 : i64} {
  func.func @_embed_fused_dma_kernel(%arg0: i32, %arg1: memref<1x3x16x16xf32, #tpu.memory_space<vmem>>, %arg2: memref<192x32xf32, #tpu.memory_space<vmem>>, %arg3: memref<4x32xf32, #tpu.memory_space<vmem>>, %arg4: memref<1x32xf32, #tpu.memory_space<vmem>>, %arg5: memref<1x5x32xf32, #tpu.memory_space<vmem>>, %arg6: memref<4x192xf32, #tpu.memory_space<vmem>>) attributes {dimension_semantics = [#tpu.dimension_semantics<parallel>], iteration_bounds = array<i64: 2>, scalar_prefetch = 0 : i64, scratch_operands = 1 : i64, tpu.core_type = #tpu.core_type<tc>, window_params = [{transform_indices = @transform_0, window_bounds = array<i64: 1, 3, 16, 16>}, {pipeline_mode = #tpu.pipeline_mode<synchronous>, transform_indices = @transform_1, window_bounds = array<i64: 192, 32>}, {pipeline_mode = #tpu.pipeline_mode<synchronous>, transform_indices = @transform_2, window_bounds = array<i64: 4, 32>}, {pipeline_mode = #tpu.pipeline_mode<synchronous>, transform_indices = @transform_3, window_bounds = array<i64: 1, 32>}, {transform_indices = @transform_4, window_bounds = array<i64: 1, 5, 32>}]} {
    %c0 = arith.constant 0 : index
    %c0_0 = arith.constant 0 : index
    %c0_1 = arith.constant 0 : index
    %c0_2 = arith.constant 0 : index
    %0 = vector.load %arg1[%c0, %c0_0, %c0_1, %c0_2] : memref<1x3x16x16xf32, #tpu.memory_space<vmem>>, vector<1x3x8x16xf32>
    %1 = vector.shape_cast %0 : vector<1x3x8x16xf32> to vector<3x8x16xf32>
    %2 = vector.shape_cast %1 : vector<3x8x16xf32> to vector<24x16xf32>
    %3 = tpu.transpose %2, [1, 0] : vector<24x16xf32> -> vector<16x24xf32>
    %4 = vector.shape_cast %3 : vector<16x24xf32> to vector<2x192xf32>
    %c0_3 = arith.constant 0 : index
    %c0_4 = arith.constant 0 : index
    %5 = vector.load %arg6[%c0_3, %c0_4] : memref<4x192xf32, #tpu.memory_space<vmem>>, vector<2x192xf32>
    tpu.vector_store %arg6[%c0_3, %c0_4], %4 {strides = array<i32>} : memref<4x192xf32, #tpu.memory_space<vmem>>, vector<2x192xf32>,
    %c0_5 = arith.constant 0 : index
    %c0_6 = arith.constant 0 : index
    %c8 = arith.constant 8 : index
    %c0_7 = arith.constant 0 : index
    %6 = vector.load %arg1[%c0_5, %c0_6, %c8, %c0_7] : memref<1x3x16x16xf32, #tpu.memory_space<vmem>>, vector<1x3x8x16xf32>
    %7 = vector.shape_cast %6 : vector<1x3x8x16xf32> to vector<3x8x16xf32>
    %8 = vector.shape_cast %7 : vector<3x8x16xf32> to vector<24x16xf32>
    %9 = tpu.transpose %8, [1, 0] : vector<24x16xf32> -> vector<16x24xf32>
    %10 = vector.shape_cast %9 : vector<16x24xf32> to vector<2x192xf32>
    %c2 = arith.constant 2 : index
    %c0_8 = arith.constant 0 : index
    %11 = vector.load %arg6[%c2, %c0_8] : memref<4x192xf32, #tpu.memory_space<vmem>>, vector<2x192xf32>
    tpu.vector_store %arg6[%c2, %c0_8], %10 {strides = array<i32>} : memref<4x192xf32, #tpu.memory_space<vmem>>, vector<2x192xf32>,
    %c0_9 = arith.constant 0 : index
    %c0_10 = arith.constant 0 : index
    %12 = vector.load %arg6[%c0_9, %c0_10] : memref<4x192xf32, #tpu.memory_space<vmem>>, vector<4x192xf32>
    %c0_11 = arith.constant 0 : index
    %c0_12 = arith.constant 0 : index
    %13 = vector.load %arg2[%c0_11, %c0_12] : memref<192x32xf32, #tpu.memory_space<vmem>>, vector<192x32xf32>
    %cst = arith.constant dense<0.000000e+00> : vector<4x32xf32>
    %14 = tpu.matmul %12, %13, %cst {dimension_numbers = #tpu.dot_dimension_numbers<[1], [0], [0], [1], [0, 0, 1, 1], [], []>} : vector<4x192xf32>, vector<192x32xf32>, vector<4x32xf32> -> vector<4x32xf32>
    %c0_13 = arith.constant 0 : index
    %c0_14 = arith.constant 0 : index
    %15 = vector.load %arg3[%c0_13, %c0_14] : memref<4x32xf32, #tpu.memory_space<vmem>>, vector<4x32xf32>
    %c0_15 = arith.constant 0 : index
    %c0_16 = arith.constant 0 : index
    %16 = vector.load %arg4[%c0_15, %c0_16] : memref<1x32xf32, #tpu.memory_space<vmem>>, vector<1x32xf32>
    %17 = arith.addf %14, %15 : vector<4x32xf32>
    %18 = tpu.concatenate %17, %16 in 0 : vector<4x32xf32>, vector<1x32xf32> -> vector<5x32xf32>
    %19 = vector.shape_cast %18 : vector<5x32xf32> to vector<1x5x32xf32>
    %c0_17 = arith.constant 0 : index
    %c0_18 = arith.constant 0 : index
    %c0_19 = arith.constant 0 : index
    %20 = vector.load %arg5[%c0_17, %c0_18, %c0_19] : memref<1x5x32xf32, #tpu.memory_space<vmem>>, vector<1x5x32xf32>
    tpu.vector_store %arg5[%c0_17, %c0_18, %c0_19], %19 {strides = array<i32>} : memref<1x5x32xf32, #tpu.memory_space<vmem>>, vector<1x5x32xf32>,
    return
  }
  func.func @transform_0(%arg0: i32) -> (i32, i32, i32, i32) {
    %c0_i32 = arith.constant 0 : i32
    %c0_i32_0 = arith.constant 0 : i32
    %c0_i32_1 = arith.constant 0 : i32
    %c0_i32_2 = arith.constant 0 : i32
    return %arg0, %c0_i32, %c0_i32_0, %c0_i32_1 : i32, i32, i32, i32
  }
  func.func @transform_1(%arg0: i32) -> (i32, i32) {
    %c0_i32 = arith.constant 0 : i32
    %c0_i32_0 = arith.constant 0 : i32
    %c0_i32_1 = arith.constant 0 : i32
    return %c0_i32, %c0_i32_0 : i32, i32
  }
  func.func @transform_2(%arg0: i32) -> (i32, i32) {
    %c0_i32 = arith.constant 0 : i32
    %c0_i32_0 = arith.constant 0 : i32
    %c0_i32_1 = arith.constant 0 : i32
    return %c0_i32, %c0_i32_0 : i32, i32
  }
  func.func @transform_3(%arg0: i32) -> (i32, i32) {
    %c0_i32 = arith.constant 0 : i32
    %c0_i32_0 = arith.constant 0 : i32
    %c0_i32_1 = arith.constant 0 : i32
    return %c0_i32, %c0_i32_0 : i32, i32
  }
  func.func @transform_4(%arg0: i32) -> (i32, i32, i32) {
    %c0_i32 = arith.constant 0 : i32
    %c0_i32_0 = arith.constant 0 : i32
    %c0_i32_1 = arith.constant 0 : i32
    return %arg0, %c0_i32, %c0_i32_0 : i32, i32, i32
  }
}

module attributes {stable_mosaic.version = 11 : i64} {
  func.func @_embed_matmul_kernel(%arg0: i32, %arg1: memref<8x256xf32, #tpu.memory_space<vmem>>, %arg2: memref<256x32xf32, #tpu.memory_space<vmem>>, %arg3: memref<4x32xf32, #tpu.memory_space<vmem>>, %arg4: memref<1x32xf32, #tpu.memory_space<vmem>>, %arg5: memref<2x5x32xf32, #tpu.memory_space<vmem>>) attributes {dimension_semantics = [#tpu.dimension_semantics<parallel>], iteration_bounds = array<i64: 1>, scalar_prefetch = 0 : i64, scratch_operands = 0 : i64, tpu.core_type = #tpu.core_type<tc>, window_params = [{transform_indices = @transform_0, window_bounds = array<i64: 8, 256>}, {pipeline_mode = #tpu.pipeline_mode<synchronous>, transform_indices = @transform_1, window_bounds = array<i64: 256, 32>}, {pipeline_mode = #tpu.pipeline_mode<synchronous>, transform_indices = @transform_2, window_bounds = array<i64: 4, 32>}, {pipeline_mode = #tpu.pipeline_mode<synchronous>, transform_indices = @transform_3, window_bounds = array<i64: 1, 32>}, {transform_indices = @transform_4, window_bounds = array<i64: 2, 5, 32>}]} {
    %c0 = arith.constant 0 : index
    %c0_0 = arith.constant 0 : index
    %0 = vector.load %arg1[%c0, %c0_0] : memref<8x256xf32, #tpu.memory_space<vmem>>, vector<8x256xf32>
    %c0_1 = arith.constant 0 : index
    %c0_2 = arith.constant 0 : index
    %1 = vector.load %arg2[%c0_1, %c0_2] : memref<256x32xf32, #tpu.memory_space<vmem>>, vector<256x32xf32>
    %cst = arith.constant dense<0.000000e+00> : vector<8x32xf32>
    %2 = tpu.matmul %0, %1, %cst {dimension_numbers = #tpu.dot_dimension_numbers<[1], [0], [0], [1], [0, 0, 1, 1], [], []>} : vector<8x256xf32>, vector<256x32xf32>, vector<8x32xf32> -> vector<8x32xf32>
    %c0_3 = arith.constant 0 : index
    %c0_4 = arith.constant 0 : index
    %3 = vector.load %arg3[%c0_3, %c0_4] : memref<4x32xf32, #tpu.memory_space<vmem>>, vector<4x32xf32>
    %c0_5 = arith.constant 0 : index
    %c0_6 = arith.constant 0 : index
    %4 = vector.load %arg4[%c0_5, %c0_6] : memref<1x32xf32, #tpu.memory_space<vmem>>, vector<1x32xf32>
    %5 = vector.extract_strided_slice %2 {offsets = [0, 0], sizes = [4, 32], strides = [1, 1]} : vector<8x32xf32> to vector<4x32xf32>
    %6 = arith.addf %5, %3 : vector<4x32xf32>
    %7 = tpu.concatenate %6, %4 in 0 : vector<4x32xf32>, vector<1x32xf32> -> vector<5x32xf32>
    %8 = vector.extract_strided_slice %2 {offsets = [4, 0], sizes = [4, 32], strides = [1, 1]} : vector<8x32xf32> to vector<4x32xf32>
    %9 = arith.addf %8, %3 : vector<4x32xf32>
    %10 = tpu.concatenate %9, %4 in 0 : vector<4x32xf32>, vector<1x32xf32> -> vector<5x32xf32>
    %11 = vector.shape_cast %7 : vector<5x32xf32> to vector<1x5x32xf32>
    %12 = vector.shape_cast %10 : vector<5x32xf32> to vector<1x5x32xf32>
    %13 = tpu.concatenate %11, %12 in 0 : vector<1x5x32xf32>, vector<1x5x32xf32> -> vector<2x5x32xf32>
    %c0_7 = arith.constant 0 : index
    %c0_8 = arith.constant 0 : index
    %c0_9 = arith.constant 0 : index
    %14 = vector.load %arg5[%c0_7, %c0_8, %c0_9] : memref<2x5x32xf32, #tpu.memory_space<vmem>>, vector<2x5x32xf32>
    tpu.vector_store %arg5[%c0_7, %c0_8, %c0_9], %13 {strides = array<i32>} : memref<2x5x32xf32, #tpu.memory_space<vmem>>, vector<2x5x32xf32>,
    return
  }
  func.func @transform_0(%arg0: i32) -> (i32, i32) {
    %c0_i32 = arith.constant 0 : i32
    %c0_i32_0 = arith.constant 0 : i32
    return %arg0, %c0_i32 : i32, i32
  }
  func.func @transform_1(%arg0: i32) -> (i32, i32) {
    %c0_i32 = arith.constant 0 : i32
    %c0_i32_0 = arith.constant 0 : i32
    %c0_i32_1 = arith.constant 0 : i32
    return %c0_i32, %c0_i32_0 : i32, i32
  }
  func.func @transform_2(%arg0: i32) -> (i32, i32) {
    %c0_i32 = arith.constant 0 : i32
    %c0_i32_0 = arith.constant 0 : i32
    %c0_i32_1 = arith.constant 0 : i32
    return %c0_i32, %c0_i32_0 : i32, i32
  }
  func.func @transform_3(%arg0: i32) -> (i32, i32) {
    %c0_i32 = arith.constant 0 : i32
    %c0_i32_0 = arith.constant 0 : i32
    %c0_i32_1 = arith.constant 0 : i32
    return %c0_i32, %c0_i32_0 : i32, i32
  }
  func.func @transform_4(%arg0: i32) -> (i32, i32, i32) {
    %c0_i32 = arith.constant 0 : i32
    %c0_i32_0 = arith.constant 0 : i32
    %c0_i32_1 = arith.constant 0 : i32
    return %arg0, %c0_i32, %c0_i32_0 : i32, i32, i32
  }
}

</mosaic_0001>

<bundles_post_ra>
// kernel: tpu_custom_call.1
= control target key start
LH: loop header
LB: loop body
LE: loop exit
PB: predicated region body
PF: predicated region fallthrough
CT: control target
= control target key end

     0   :  { %vm130_vm0 = vcmask 1043456   ;;  %vm140_vm1 = vcmask 258048   ;;  %s354_s1 = inlined_call_operand.vmem [shape: f32[256,32], index: 1, kind: input, shape index: {}]   ;;  %s355_s0 = inlined_call_operand.vmem [shape: f32[8,256], index: 0, kind: input, shape index: {}]   ;;  %s356_s2 = inlined_call_operand.vmem [shape: f32[4,32], index: 2, kind: input, shape index: {}]   ;;  %s357_s3 = inlined_call_operand.vmem [shape: f32[1,32], index: 3, kind: input, shape index: {}]   ;;  %s358_s4 = inlined_call_operand.vmem [shape: f32[2,5,32], index: 4, kind: output, shape index: {}]  }
   0x1   :  { %v35_v0 = vld [vmem:[%s354_s1 + $0x80] sm:$0xff]  ;;  %v36_v1 = vld [vmem:[%s354_s1 + $0x88] sm:$0xff]  ;;  %v37_v5 = vld [vmem:[%s354_s1 + $0x90] sm:$0xff] }
   0x2   :  { %v19_v2 = vld [vmem:[%s354_s1] sm:$0xff]  ;;  %v183_v3 = vpack.c.bf16 %v36_v1, %v35_v0  ;;  %v20_v4 = vld [vmem:[%s354_s1 + $0x8] sm:$0xff]  ;;  %v38_v6 = vld [vmem:[%s354_s1 + $0x98] sm:$0xff] }
   0x3   :  { %v185_v7 = vpack.c.bf16 %v20_v4, %v19_v2  ;;  %v187_v8 = vpack.c.bf16 %v38_v6, %v37_v5  ;;  %v21_v9 = vld [vmem:[%s354_s1 + $0x10] sm:$0xff]  ;;  %v22_v10 = vld [vmem:[%s354_s1 + $0x18] sm:$0xff]  ;;  %v39_v11 = vld [vmem:[%s354_s1 + $0xa0] sm:$0xff] }
   0x4   :  { %184 = vmatprep.subr.bf16.mxu0 %v183_v3  ;;  %v40_v12 = vld [vmem:[%s354_s1 + $0xa8] sm:$0xff]  ;;  %v189_v13 = vpack.c.bf16 %v22_v10, %v21_v9  ;;  %v23_v15 = vld [vmem:[%s354_s1 + $0x20] sm:$0xff]  ;;  %v41_v17 = vld [vmem:[%s354_s1 + $0xb0] sm:$0xff] }
   0x5   :  { %186 = vmatpush3.bf16.msra.mxu0 %v185_v7  ;;  %v191_v14 = vpack.c.bf16 %v40_v12, %v39_v11  ;;  %v24_v16 = vld [vmem:[%s354_s1 + $0x28] sm:$0xff]  ;;  %v42_v18 = vld [vmem:[%s354_s1 + $0xb8] sm:$0xff]  ;;  %v25_v21 = vld [vmem:[%s354_s1 + $0x30] sm:$0xff] }
   0x6   :  { %188 = vmatprep.subr.bf16.mxu0 %v187_v8  ;;  %v193_v19 = vpack.c.bf16 %v24_v16, %v23_v15  ;;  %v195_v20 = vpack.c.bf16 %v42_v18, %v41_v17  ;;  %v26_v22 = vld [vmem:[%s354_s1 + $0x38] sm:$0xff]  ;;  %v43_v23 = vld [vmem:[%s354_s1 + $0xc0] sm:$0xff]  ;;  %v44_v24 = vld [vmem:[%s354_s1 + $0xc8] sm:$0xff] }
   0x7   :  { %v18_v25 = vld [vmem:[%s355_s0 + $0x8] sm:$0xff]  ;;  %v197_v26 = vpack.c.bf16 %v26_v22, %v25_v21  ;;  %v199_v27 = vpack.c.bf16 %v44_v24, %v43_v23  ;;  %v27_v28 = vld [vmem:[%s354_s1 + $0x40] sm:$0xff]  ;;  %v45_v30 = vld [vmem:[%s354_s1 + $0xd0] sm:$0xff] }
   0x8   :  { %115 = vmatprep.mubr.f32.mxu0 %v18_v25  ;;  %v28_v29 = vld [vmem:[%s354_s1 + $0x48] sm:$0xff]  ;;  %v46_v31 = vld [vmem:[%s354_s1 + $0xd8] sm:$0xff]  ;;  %v29_v34 = vld [vmem:[%s354_s1 + $0x50] sm:$0xff] }
   0x9   :  { %190 = vmatpush3.bf16.msra.mxu0 %v189_v13  ;;  %v201_v32 = vpack.c.bf16 %v28_v29, %v27_v28  ;;  %v203_v33 = vpack.c.bf16 %v46_v31, %v45_v30  ;;  %v30_v35 = vld [vmem:[%s354_s1 + $0x58] sm:$0xff]  ;;  %v47_v36 = vld [vmem:[%s354_s1 + $0xe0] sm:$0xff]  ;;  %v48_v37 = vld [vmem:[%s354_s1 + $0xe8] sm:$0xff] }
   0xa   :  { %192 = vmatprep.subr.bf16.mxu0 %v191_v14  ;;  %v205_v38 = vpack.c.bf16 %v30_v35, %v29_v34  ;;  %v207_v39 = vpack.c.bf16 %v48_v37, %v47_v36  ;;  %v31_v40 = vld [vmem:[%s354_s1 + $0x60] sm:$0xff]  ;;  %v32_v41 = vld [vmem:[%s354_s1 + $0x68] sm:$0xff]  ;;  %v49_v42 = vld [vmem:[%s354_s1 + $0xf0] sm:$0xff] }
   0xb   :  { %v50_v43 = vld [vmem:[%s354_s1 + $0xf8] sm:$0xff]  ;;  %v209_v44 = vpack.c.bf16 %v32_v41, %v31_v40  ;;  %v33_v46 = vld [vmem:[%s354_s1 + $0x70] sm:$0xff]  ;;  %v17_v49 = vld [vmem:[%s355_s0] sm:$0xff] }
   0xc   :  { %v211_v45 = vpack.c.bf16 %v50_v43, %v49_v42  ;;  %v34_v47 = vld [vmem:[%s354_s1 + $0x78] sm:$0xff]  ;;  %v121_v50 = vld [vmem:[%s356_s2] sm:$0xf] }
   0xd   :  { %194 = vmatpush3.bf16.msra.mxu0 %v193_v19  ;;  %v213_v48 = vpack.c.bf16 %v34_v47, %v33_v46  ;;  %v133_v52 = vrot.slane %v121_v50, 4  ;;  %v147_v55 = vld [vmem:[%s357_s3] ss:$0 sm:$0xff] }
   0xe   :  { %196 = vmatprep.subr.bf16.mxu0 %v195_v20 }
  0x11   :  { %198 = vmatpush3.bf16.msra.mxu0 %v197_v26 }
  0x12   :  { %200 = vmatprep.subr.bf16.mxu0 %v199_v27 }
  0x15   :  { %202 = vmatpush3.bf16.msra.mxu0 %v201_v32 }
  0x16   :  { %204 = vmatprep.subr.bf16.mxu0 %v203_v33 }
  0x19   :  { %206 = vmatpush3.bf16.msra.mxu0 %v205_v38 }
  0x1a   :  { %208 = vmatprep.subr.bf16.mxu0 %v207_v39 }
  0x1d   :  { %210 = vmatpush3.bf16.msra.mxu0 %v209_v44 }
  0x1e   :  { %212 = vmatprep.subr.bf16.mxu0 %v211_v45 }
  0x21   :  { %214 = vmatpush3.bf16.msra.mxu0 %v213_v48 }
  0x24   :  { %116 = vmatmul.mubr.f32.vlgmr.msra.gmra.mrb[0].mxu0 %v17_v49 }
  0xf7   :  { %v180_v51 = vpop.f32.mrb[0].mxu0 }
  0xf8   :  { %v181_v53 = vpop.f32.mrb[1].mxu0 }
  0xf9   :  { %v182_v54 = vadd.f32 %v181_v53, %v180_v51 }
  0xfb   :  { %v123_v56 = vadd.f32 %v182_v54, %v121_v50  ;;  %v135_v57 = vadd.f32 %v182_v54, %v133_v52 }
  0xfd   :  { %v131_v58 = vsel %vm130_vm0, %v123_v56, %v147_v55  ;;  %v137_v59 = vrot.slane %v135_v57, 4 }
  0xfe   :  { %141 = vst.msk [vmem:[%s358_s4] sm:$0x1f] %vm140_vm1, %v131_v58 }
  0xff   :  { %v139_v60 = vsel %vm130_vm0, %v137_v59, %v147_v55 }
 0x100   :  { %142 = vst.msk [vmem:[%s358_s4 + $0x8] sm:$0x1f] %vm140_vm1, %v139_v60 }

</bundles_post_ra>
